<compile_context>
chip_gen: v6e
topology: v6e:2x2x1
jax: 0.10.0
libtpu: 0.0.40
codegen_flags: <defaults>
</compile_context>

<pallas_src>
import functools

import jax
import jax.numpy as jnp
from jax.experimental import pallas as pl
from jax.experimental.pallas import tpu as pltpu


def _round_up(x, m):
    return ((x + m - 1) // m) * m


def _cdiv(a, b):
    return (a + b - 1) // b


def _softmax_half_and_log(x, axis):
    """Returns (0.5*softmax(x), log_softmax(x)) along `axis`, with one exp."""
    mx = jnp.max(x, axis=axis, keepdims=True)
    shifted = x - mx
    e = jnp.exp(shifted)                       # one exp per element, reused
    s = jnp.sum(e, axis=axis, keepdims=True)
    half_p = e * (0.5 / s)                     # 0.5 folded into per-row scale
    log_p = shifted - jnp.log(s)               # log_softmax
    return half_p, log_p


def js_div_kernel(post_ref, prior_ref, partial_ref, *, batch, lane_dense):
    i = pl.program_id(0)
    post = post_ref[...].astype(jnp.float32)    # (TB, C)
    prior = prior_ref[...].astype(jnp.float32)
    tb = post.shape[0]                          # batch rows per tile

    if lane_dense:
        # C % 128 == 0: aligned on-chip (XLU) transpose -> batch on the
        # 128-lane axis, every VPU/EUP op fully dense; reduce over sublanes.
        post, prior = post.T, prior.T           # (C, TB)
        red_axis, batch_axis = 0, 1
    else:
        # Small / unaligned C: keep the natural layout, reduce along lanes.
        red_axis, batch_axis = 1, 0

    half_p, log_p = _softmax_half_and_log(post, red_axis)
    half_q, log_q = _softmax_half_and_log(prior, red_axis)

    m = half_p + half_q                          # = 0.5 * (p + q)
    # PyTorch kl_div zeroes target==0 terms: max() keeps the log finite and an
    # underflowed m == 0 then contributes exactly 0 * finite == 0 (no selects).
    log_m = jnp.log(jnp.maximum(m, 1e-37))
    term = m * (2.0 * log_m - log_p - log_q)

    per_elem = jnp.sum(term, axis=red_axis, keepdims=True)   # one value per row
    # Exactly zero out padding batch rows (ragged last tile / tile > B) with a
    # SELECT so garbage or NaN from the unloaded region cannot leak in.
    bidx = jax.lax.broadcasted_iota(jnp.int32, per_elem.shape, batch_axis)
    per_elem = jnp.where(bidx + i * tb < batch, per_elem, 0.0)

    partial_ref[0, 0] = jnp.sum(per_elem)


def categorical_js_div_loss(posterior_za_logits, prior_za_logits):
    """posterior/prior logits: (B, C), softmax over dim 1. Returns scalar f32."""
    assert posterior_za_logits.shape == prior_za_logits.shape
    assert posterior_za_logits.ndim == 2
    b, c = posterior_za_logits.shape
    lane = 128

    lane_dense = (c % lane == 0)       # aligned in-kernel transpose is safe
    cp = _round_up(c, lane)            # VMEM lane footprint of one row (f32)

    # ~2 MiB per input block => 2 inputs x 2 pipeline buffers ~8 MiB, plus the
    # in-kernel f32 temporaries; comfortably inside the 32 MiB scoped VMEM
    # requested below on every generation (v5e default 16 MiB, v6e/v7x 32 MiB,
    # v7x physical 64 MiB per TC).
    tb_cap = max(lane, ((2 * 1024 * 1024) // (4 * cp)) // lane * lane)
    # Keep >=2 grid steps for large B so the "parallel" axis spans both v7x TCs.
    tb = min(tb_cap, _round_up(_cdiv(b, 2), lane))
    g = _cdiv(b, tb)

    partials = pl.pallas_call(
        functools.partial(js_div_kernel, batch=b, lane_dense=lane_dense),
        out_shape=jax.ShapeDtypeStruct((g, 1), jnp.float32),
        grid=(g,),
        in_specs=[
            pl.BlockSpec((tb, c), lambda i: (i, 0)),
            pl.BlockSpec((tb, c), lambda i: (i, 0)),
        ],
        out_specs=pl.BlockSpec((1, 1), lambda i: (i, 0),
                               memory_space=pltpu.MemorySpace.SMEM),
        compiler_params=pltpu.CompilerParams(
            dimension_semantics=("parallel",),
            vmem_limit_bytes=32 * 1024 * 1024),
    )(posterior_za_logits, prior_za_logits)

    return 0.5 * jnp.sum(partials) / b


def _reference_js_div_loss(post, prior):
    # Plain-JAX reference mirroring the PyTorch module exactly.
    p = jax.nn.softmax(post, axis=1)
    q = jax.nn.softmax(prior, axis=1)
    m = 0.5 * (p + q)
    log_p = jax.nn.log_softmax(post, axis=1)
    log_q = jax.nn.log_softmax(prior, axis=1)
    bsz = post.shape[0]
    loss = jnp.sum(m * (jnp.log(m) - log_p)) / bsz
    loss = loss + jnp.sum(m * (jnp.log(m) - log_q)) / bsz
    return 0.5 * loss


if __name__ == "__main__":
    key = jax.random.PRNGKey(0)
    # (B, C) configs: lane-reduce path with tile > B (8, 32), ragged two-tile
    # grid (200, 32), and the lane-dense in-kernel-transpose path (256, 128).
    for bsz, cdim in ((8, 32), (200, 32), (256, 128)):
        key, k1, k2 = jax.random.split(key, 3)
        posterior_za_logits = 3.0 * jax.random.normal(k1, (bsz, cdim), jnp.float32)
        prior_za_logits = 3.0 * jax.random.normal(k2, (bsz, cdim), jnp.float32)

        loss = jax.block_until_ready(
            categorical_js_div_loss(posterior_za_logits, prior_za_logits))
        ref = jax.block_until_ready(
            _reference_js_div_loss(posterior_za_logits, prior_za_logits))
        assert jnp.allclose(loss, ref, rtol=1e-5, atol=1e-6), (bsz, cdim, loss, ref)

    print("KERNEL_OK")
</pallas_src>

<mosaic_0001>
module attributes {stable_mosaic.version = 11 : i64} {
  func.func @js_div_kernel(%arg0: i32, %arg1: memref<128x32xf32, #tpu.memory_space<vmem>>, %arg2: memref<128x32xf32, #tpu.memory_space<vmem>>, %arg3: memref<1x1xf32, #tpu.memory_space<smem>>) attributes {dimension_semantics = [#tpu.dimension_semantics<parallel>], iteration_bounds = array<i64: 1>, scalar_prefetch = 0 : i64, scratch_operands = 0 : i64, tpu.core_type = #tpu.core_type<tc>, window_params = [{transform_indices = @transform_0, window_bounds = array<i64: 128, 32>}, {transform_indices = @transform_1, window_bounds = array<i64: 128, 32>}, {transform_indices = @transform_2, window_bounds = array<i64: 1, 1>}]} {
    %c0 = arith.constant 0 : index
    %c0_0 = arith.constant 0 : index
    %0 = vector.load %arg1[%c0, %c0_0] : memref<128x32xf32, #tpu.memory_space<vmem>>, vector<128x32xf32>
    %c0_1 = arith.constant 0 : index
    %c0_2 = arith.constant 0 : index
    %1 = vector.load %arg2[%c0_1, %c0_2] : memref<128x32xf32, #tpu.memory_space<vmem>>, vector<128x32xf32>
    %cst = arith.constant dense<0xFF800000> : vector<128xf32>
    %2 = vector.multi_reduction <maximumf>, %0, %cst [1] : vector<128x32xf32> to vector<128xf32>
    %3 = vector.shape_cast %2 : vector<128xf32> to vector<128x1xf32>
    %4 = vector.broadcast %3 : vector<128x1xf32> to vector<128x32xf32>
    %5 = arith.subf %0, %4 : vector<128x32xf32>
    %6 = math.exp %5 : vector<128x32xf32>
    %cst_3 = arith.constant dense<0.000000e+00> : vector<128xf32>
    %7 = vector.multi_reduction <add>, %6, %cst_3 [1] : vector<128x32xf32> to vector<128xf32>
    %8 = vector.shape_cast %7 : vector<128xf32> to vector<128x1xf32>
    %cst_4 = arith.constant 5.000000e-01 : f32
    %9 = vector.broadcast %cst_4 : f32 to vector<128x1xf32>
    %10 = arith.divf %9, %8 : vector<128x1xf32>
    %11 = vector.broadcast %10 : vector<128x1xf32> to vector<128x32xf32>
    %12 = arith.mulf %6, %11 : vector<128x32xf32>
    %13 = math.log %8 : vector<128x1xf32>
    %14 = vector.broadcast %13 : vector<128x1xf32> to vector<128x32xf32>
    %15 = arith.subf %5, %14 : vector<128x32xf32>
    %cst_5 = arith.constant dense<0xFF800000> : vector<128xf32>
    %16 = vector.multi_reduction <maximumf>, %1, %cst_5 [1] : vector<128x32xf32> to vector<128xf32>
    %17 = vector.shape_cast %16 : vector<128xf32> to vector<128x1xf32>
    %18 = vector.broadcast %17 : vector<128x1xf32> to vector<128x32xf32>
    %19 = arith.subf %1, %18 : vector<128x32xf32>
    %20 = math.exp %19 : vector<128x32xf32>
    %cst_6 = arith.constant dense<0.000000e+00> : vector<128xf32>
    %21 = vector.multi_reduction <add>, %20, %cst_6 [1] : vector<128x32xf32> to vector<128xf32>
    %22 = vector.shape_cast %21 : vector<128xf32> to vector<128x1xf32>
    %cst_7 = arith.constant 5.000000e-01 : f32
    %23 = vector.broadcast %cst_7 : f32 to vector<128x1xf32>
    %24 = arith.divf %23, %22 : vector<128x1xf32>
    %25 = vector.broadcast %24 : vector<128x1xf32> to vector<128x32xf32>
    %26 = arith.mulf %20, %25 : vector<128x32xf32>
    %27 = math.log %22 : vector<128x1xf32>
    %28 = vector.broadcast %27 : vector<128x1xf32> to vector<128x32xf32>
    %29 = arith.subf %19, %28 : vector<128x32xf32>
    %30 = arith.addf %12, %26 : vector<128x32xf32>
    %cst_8 = arith.constant 9.99999991E-38 : f32
    %31 = vector.broadcast %cst_8 : f32 to vector<128x32xf32>
    %32 = arith.maximumf %30, %31 : vector<128x32xf32>
    %33 = math.log %32 : vector<128x32xf32>
    %cst_9 = arith.constant 2.000000e+00 : f32
    %34 = vector.broadcast %cst_9 : f32 to vector<128x32xf32>
    %35 = arith.mulf %34, %33 : vector<128x32xf32>
    %36 = arith.subf %35, %15 : vector<128x32xf32>
    %37 = arith.subf %36, %29 : vector<128x32xf32>
    %38 = arith.mulf %30, %37 : vector<128x32xf32>
    %cst_10 = arith.constant dense<0.000000e+00> : vector<128xf32>
    %39 = vector.multi_reduction <add>, %38, %cst_10 [1] : vector<128x32xf32> to vector<128xf32>
    %40 = vector.shape_cast %39 : vector<128xf32> to vector<128x1xf32>
    %41 = tpu.iota {dimensions = array<i32: 0>} : vector<128x1xi32>
    %c128_i32 = arith.constant 128 : i32
    %42 = arith.muli %arg0, %c128_i32 : i32
    %43 = vector.broadcast %42 : i32 to vector<128x1xi32>
    %44 = arith.addi %41, %43 : vector<128x1xi32>
    %c8_i32 = arith.constant 8 : i32
    %45 = vector.broadcast %c8_i32 : i32 to vector<128x1xi32>
    %46 = arith.cmpi slt, %44, %45 : vector<128x1xi32>
    %cst_11 = arith.constant 0.000000e+00 : f32
    %47 = vector.broadcast %cst_11 : f32 to vector<128x1xf32>
    %48 = arith.select %46, %40, %47 : vector<128x1xi1>, vector<128x1xf32>
    %49 = vector.shape_cast %48 : vector<128x1xf32> to vector<1x128x1xf32>
    %cst_12 = arith.constant dense<0.000000e+00> : vector<1xf32>
    %50 = vector.multi_reduction <add>, %49, %cst_12 [1, 2] : vector<1x128x1xf32> to vector<1xf32>
    %51 = vector.shape_cast %50 : vector<1xf32> to vector<1x1x1xf32>
    %52 = vector.extract %51[0, 0, 0] : f32 from vector<1x1x1xf32>
    %c0_13 = arith.constant 0 : index
    %c0_14 = arith.constant 0 : index
    %53 = memref.load %arg3[%c0_13, %c0_14] : memref<1x1xf32, #tpu.memory_space<smem>>
    memref.store %52, %arg3[%c0_13, %c0_14] : memref<1x1xf32, #tpu.memory_space<smem>>
    return
  }
  func.func @transform_0(%arg0: i32) -> (i32, i32) {
    %c0_i32 = arith.constant 0 : i32
    %c0_i32_0 = arith.constant 0 : i32
    return %arg0, %c0_i32 : i32, i32
  }
  func.func @transform_1(%arg0: i32) -> (i32, i32) {
    %c0_i32 = arith.constant 0 : i32
    %c0_i32_0 = arith.constant 0 : i32
    return %arg0, %c0_i32 : i32, i32
  }
  func.func @transform_2(%arg0: i32) -> (i32, i32) {
    %c0_i32 = arith.constant 0 : i32
    %c0_i32_0 = arith.constant 0 : i32
    return %arg0, %c0_i32 : i32, i32
  }
}

</mosaic_0001>

<bundles_post_ra>
// kernel: tpu_custom_call.1
= control target key start
LH: loop header
LB: loop body
LE: loop exit
PB: predicated region body
PF: predicated region fallthrough
CT: control target
= control target key end

     0   :  { %7 = vsyncpa [#allocation3], 0  ;;  %s963_s0 = inlined_call_operand.hbm [shape: f32[8,32], index: 0, kind: input, shape index: {}]   ;;  %s964_s1 = inlined_call_operand.hbm [shape: f32[8,32], index: 1, kind: input, shape index: {}]   ;;  %s965_s2 = inlined_call_operand.hbm [shape: f32[1,1], index: 2, kind: output, shape index: {}]  }
   0x1   :  { %8 = vsyncpa [#allocation6], 0 }
   0x2   :  { %9 = vsyncpa [#allocation4], 0 }
   0x3   :  { %14 = vsyncadd [#allocation3], 1920  ;;  %s929_s9 = smov [#allocation2]  }
   0x4   :  { %s15_s10 = sshll.u32 %s929_s9, 4  ;;  %s16_s10 = int_to_ptr.vmem [resolvable:$true] %s15_s10 }
   0x5   :  { %s883_s11 = scalar_lea.vmem %s16_s10, 128  ;;  %s887_s12 = scalar_lea.vmem %s16_s10, 2048 }
   0x6   :  { %p884_p0 = scmp.ne.s32.totalorder %s16_s10, %s883_s11  ;;  %p888_p1 = scmp.lt.s32.totalorder %s16_s10, %s16_s10 }
   0x7   :  { %p889_p2 = scmp.lt.s32.totalorder %s887_s12, %s883_s11 }
   0x9   :  { %p890_p3 = por %p889_p2, %p888_p1 }
   0xb   :  { %p891_p4 = pnand %p890_p3, %p884_p0 }
   0xd   :  { %894 = shalt.err (!%p891_p4)
}
   0xe   :  { %s930_s13 = smov 128   ;;  %s931_s14 = smov 8  }
   0xf   :  { %21 = dma.hbm_to_vmem [thread:$0]  %s963_s0, 128, %s16_s10, [#allocation3], %s930_s13, %s930_s13, %s931_s14  }
  0x10   :  { %26 = vsyncadd [#allocation6], 1920  ;;  %s932_s17 = smov [#allocation5]  }
  0x11   :  { %s27_s18 = sshll.u32 %s932_s17, 4  ;;  %s28_s18 = int_to_ptr.vmem [resolvable:$true] %s27_s18 }
  0x12   :  { %s903_s19 = scalar_lea.vmem %s28_s18, 128  ;;  %s907_s20 = scalar_lea.vmem %s28_s18, 2048 }
  0x13   :  { %p904_p5 = scmp.ne.s32.totalorder %s28_s18, %s903_s19  ;;  %p908_p6 = scmp.lt.s32.totalorder %s28_s18, %s28_s18 }
  0x14   :  { %p909_p7 = scmp.lt.s32.totalorder %s907_s20, %s903_s19 }
  0x16   :  { %p910_p8 = por %p909_p7, %p908_p6 }
  0x18   :  { %p911_p9 = pnand %p910_p8, %p904_p5 }
  0x1a   :  { %914 = shalt.err (!%p911_p9)
}
  0x1b   :  { %33 = dma.hbm_to_vmem [thread:$0]  %s964_s1, 128, %s28_s18, [#allocation6], %s930_s13, %s930_s13, %s931_s14  }
  0x1c   :  { %923 = dma.done.wait [#allocation3], 2048  }
  0x1d   :  { %924 = vsyncadd [#allocation3], 4294965248 }
  0x1e   :  { %925 = dma.done.wait [#allocation6], 2048  }
  0x1f   :  { %926 = vsyncadd [#allocation6], 4294965248  ;;  %vm72_vm0 = vcmask 261120   ;;  %v40_v0 = vld [vmem:[#allocation2] sm:$0xff]  ;;  %vm796_vm1 = vcmask 7168   ;;  %s933_s1 = smov [#allocation7]  }
  0x20   :  { %v56_v1 = vld [vmem:[#allocation5] sm:$0xff]  ;;  %v73_v2 = vsel %vm72_vm0, %v40_v0, -inf }
  0x21   :  { %74 = vmax.xlane.f32.xlu0 %v73_v2  ;;  %v313_v3 = vsel %vm72_vm0, %v56_v1, -inf }
  0x25   :  { %314 = vmax.xlane.f32.xlu0 %v313_v3 }
  0xaa   :  { %v75_v4 = vpop.xlane.xlu0 %74 }
  0xab   :  { %v121_v5 = vsub.f32 %v40_v0, %v75_v4 }
  0xad   :  { %v137_v6 = vmul.f32 1.442695, %v121_v5 }
  0xae   :  { %v315_v7 = vpop.xlane.xlu0 %314 }
  0xaf   :  { %861 = vpow2.f32 %v137_v6  ;;  %v361_v8 = vsub.f32 %v56_v1, %v315_v7 }
  0xb1   :  { %v377_v9 = vmul.f32 1.442695, %v361_v8 }
  0xb3   :  { %863 = vpow2.f32 %v377_v9 }
  0xbc   :  { %v862_v10 = vpop.eup %861 }
  0xbd   :  { %v169_v11 = vsel %vm72_vm0, %v862_v10, 0.0 }
  0xbe   :  { %170 = vadd.xlane.f32.xlu1 %v169_v11 }
  0xc0   :  { %v864_v12 = vpop.eup %863 }
  0xc1   :  { %v409_v13 = vsel %vm72_vm0, %v864_v12, 0.0 }
  0xc2   :  { %410 = vadd.xlane.f32.xlu1 %v409_v13 }
 0x147   :  { %v171_v14 = vpop.xlane.xlu1 %170 }
 0x148   :  { %865 = vrcp.f32 %v171_v14 }
 0x14b   :  { %v411_v15 = vpop.xlane.xlu1 %410 }
 0x14c   :  { %867 = vrcp.f32 %v411_v15 }
 0x14d   :  { %869 = vlog2.f32 %v171_v14 }
 0x14e   :  { %871 = vlog2.f32 %v411_v15 }
 0x155   :  { %v866_v16 = vpop.eup %865 }
 0x156   :  { %v218_v17 = vmul.f32 0.5, %v866_v16 }
 0x158   :  { %v249_v20 = vmul.f32 %v862_v10, %v218_v17 }
 0x159   :  { %v868_v18 = vpop.eup %867 }
 0x15a   :  { %v458_v19 = vmul.f32 0.5, %v868_v18  ;;  %v870_v24 = vpop.eup %869 }
 0x15b   :  { %v872_v25 = vpop.eup %871  ;;  %v266_v26 = vmul.f32 0.6931472, %v870_v24 }
 0x15c   :  { %v489_v21 = vmul.f32 %v864_v12, %v458_v19  ;;  %v506_v28 = vmul.f32 0.6931472, %v872_v25 }
 0x15d   :  { %v297_v30 = vsub.f32 %v121_v5, %v266_v26 }
 0x15e   :  { %v553_v22 = vadd.f32 %v489_v21, %v249_v20  ;;  %v537_v32 = vsub.f32 %v361_v8, %v506_v28 }
 0x160   :  { %v569_v23 = vmax.f32 %v553_v22, 1e-37 }
 0x162   :  { %873 = vlog2.f32 %v569_v23 }
 0x16f   :  { %v874_v27 = vpop.eup %873 }
 0x170   :  { %v586_v29 = vmul.f32 0.6931472, %v874_v27 }
 0x172   :  { %v617_v31 = vmul.f32 2.0, %v586_v29 }
 0x174   :  { %v633_v33 = vsub.f32 %v617_v31, %v297_v30 }
 0x176   :  { %v649_v34 = vsub.f32 %v633_v33, %v537_v32 }
 0x178   :  { %v665_v35 = vmul.f32 %v649_v34, %v553_v22 }
 0x17a   :  { %v681_v36 = vsel %vm72_vm0, %v665_v35, 0.0 }
 0x17b   :  { %682 = vadd.xlane.f32.xlu0 %v681_v36 }
 0x204   :  { %v683_v37 = vpop.xlane.xlu0 %682 }
 0x205   :  { %v797_v38 = vsel %vm796_vm1, %v683_v37, 0.0 }
 0x206   :  { %828 = vadd.xlane.f32.xlu1 %v797_v38 }
 0x28f   :  { %v829_v39 = vpop.xlane.xlu1 %828 }
 0x290   :  { %v830_v40 = vrot.slane %v829_v39, 4 }
 0x292   :  { %v831_v41 = vadd.f32 %v830_v40, %v829_v39 }
 0x294   :  { %v832_v42 = vrot.slane %v831_v41, 2 }
 0x296   :  { %v833_v43 = vadd.f32 %v832_v42, %v831_v41 }
 0x298   :  { %v834_v44 = vrot.slane %v833_v43, 1 }
 0x29a   :  { %v835_v45 = vadd.f32 %v834_v44, %v833_v43 }
 0x29c   :  { %854 = vpush %v835_v45 }
 0x2cd   :  { %s855_s0 = spop %854 }
 0x2ce   :  { %838 = sst [smem:[#allocation7]] %s855_s0 }
 0x2cf   :  { %846 = dma.smem_to_hbm %s933_s1, 16, %s965_s2, [#allocation4]  }
 0x2d0   :  { %927 = dma.done.wait [#allocation4], 16  }
 0x2d1   :  { %928 = vsyncadd [#allocation4], 4294967280 }
 0x2d2   :  { %850 = sfence }
 0x2d3   :  { %851 = vsyncpa [#allocation3], 1 }
 0x2d4   :  { %852 = vsyncpa [#allocation6], 1 }
 0x2d5   :  { %853 = vsyncpa [#allocation4], 1 }

</bundles_post_ra>
